<compile_context>
chip_gen: v5e
topology: v5e:2x2
jax: 0.10.0
libtpu: 0.0.40
codegen_flags: <defaults>
</compile_context>

<pallas_src>
import jax
import jax.numpy as jnp
from jax import lax
from jax.experimental import pallas as pl
from jax.experimental.pallas import tpu as pltpu

_ROWS_PER_BAND = 2  # image rows packed per lane-dense "band" row (2*W*C = 128 here)


def _res_kernel(x_ref, w1_ref, s1_ref, b1_ref, w2_ref, s2_ref, b2_ref, o_ref):
    # x_ref:  (NB, H2, P*W*C)   f32   NB batch elements, H2 = H/P bands, 128 lanes
    # w1_ref: (P*W*C, P*W*Ch)   bf16  block-diagonal 1x1 conv weight
    # s1_ref: (1, P*W*Ch)       f32   folded BN1 scale (tiled over P*W)
    # b1_ref: (1, P*W*Ch)       f32   folded BN1 bias
    # w2_ref: (3*P*W*Ch, P*W*C) bf16  block-Toeplitz 3x3 conv weight, band-offset major
    # s2_ref: (1, P*W*C)        f32   folded BN2 scale
    # b2_ref: (1, P*W*C)        f32   folded BN2 bias
    # o_ref:  (NB, H2, P*W*C)   f32
    NB, H2, PWC = x_ref.shape
    PWCh = w1_ref.shape[1]
    M = NB * H2
    f32 = jnp.float32
    bf16 = jnp.bfloat16

    x = x_ref[...].reshape(M, PWC)                                    # (M, 128) f32

    # --- cv1: 1x1 conv as a single block-diagonal matmul + folded BN1 + ReLU ------
    y1 = jnp.dot(x.astype(bf16), w1_ref[...], preferred_element_type=f32)
    y1 = jnp.maximum(y1 * s1_ref[...] + b1_ref[...], 0.0)             # (M, PWCh) f32

    # --- cv2: 3x3 conv as ONE fused matmul.  The kw taps, the width zero-padding
    #     and the intra-band height taps live in the block-Toeplitz weight; the
    #     cross-band height halo is built in-register by shifting the band axis
    #     with zero fill (no VMEM scratch round trip). ------------------------------
    zrow = jnp.zeros((1, PWCh), f32)
    prev_b = jnp.concatenate([zrow, y1[:M - 1, :]], axis=0)           # band r-1
    next_b = jnp.concatenate([y1[1:, :], zrow], axis=0)               # band r+1
    if NB > 1:
        # Zero the halo rows at batch boundaries inside this block (keeps batch
        # elements independent when several are folded into M).
        r = lax.broadcasted_iota(jnp.int32, (M, 1), 0)
        prev_b = jnp.where((r % H2) == 0, 0.0, prev_b)
        next_b = jnp.where((r % H2) == H2 - 1, 0.0, next_b)
    acat = jnp.concatenate([prev_b, y1, next_b], axis=1).astype(bf16)  # (M, 3*PWCh)
    y2 = jnp.dot(acat, w2_ref[...], preferred_element_type=f32)        # (M, PWC)
    y2 = jnp.maximum(y2 * s2_ref[...] + b2_ref[...], 0.0)

    # --- residual add + lane-dense store (f32) ------------------------------------
    o_ref[...] = (x + y2).reshape(NB, H2, PWC).astype(o_ref.dtype)


def pack_res_params(w1, s1, b1, w2_khkwcico, s2, b2, W):
    """Pack conv/BN params for the band layout.  Call ONCE (weights are static).

    w1: (C, Ch) 1x1 weight (in -> hidden).  w2: (kh, kw, Ch, C) 3x3 weight.
    """
    C, Ch = w1.shape
    P = _ROWS_PER_BAND
    PW = P * W
    PWC, PWCh = PW * C, PW * Ch

    # 1x1 conv -> block-diagonal over the P*W pixels of a band.
    w1big = jnp.kron(jnp.eye(PW, dtype=jnp.float32), w1).astype(jnp.bfloat16)

    # 3x3 conv -> block-Toeplitz slabs over band offsets d = -1, 0, +1, stacked
    # along K.  slab_d[(p_in, w_in, ci), (p_out, w_out, co)] = w2[kh, kw, ci, co]
    # with kh = P*d + p_in - p_out + 1 and kw = w_in - w_out + 1 (zero otherwise,
    # which implements the height/width zero-padding implicitly).
    slabs = []
    for d in (-1, 0, 1):
        t = jnp.zeros((PWCh, PWC), jnp.float32)
        for p_in in range(P):
            for p_out in range(P):
                kh = P * d + p_in - p_out + 1
                if 0 <= kh <= 2:
                    blk = jnp.zeros((W * Ch, W * C), jnp.float32)
                    for kw in range(3):
                        dw = kw - 1                                        # w_in - w_out
                        shift = jnp.eye(W, W, k=-dw, dtype=jnp.float32)     # [w_in, w_out]
                        blk = blk + jnp.kron(shift, w2_khkwcico[kh, kw])
                    sel = jnp.zeros((P, P), jnp.float32).at[p_in, p_out].set(1.0)
                    t = t + jnp.kron(sel, blk)
        slabs.append(t)
    w2toe = jnp.concatenate(slabs, axis=0).astype(jnp.bfloat16)

    # Folded BN params tiled over the P*W pixels of a band.
    s1r = jnp.tile(s1, PW).reshape(1, PWCh)
    b1r = jnp.tile(b1, PW).reshape(1, PWCh)
    s2r = jnp.tile(s2, PW).reshape(1, PWC)
    b2r = jnp.tile(b2, PW).reshape(1, PWC)
    return w1big, s1r, b1r, w2toe, s2r, b2r


def res_forward_pallas(x_nhwc, packed):
    """x_nhwc: (B, H, W, C) f32.  packed: output of pack_res_params.  Returns same shape."""
    w1big, s1r, b1r, w2toe, s2r, b2r = packed
    B, H, W, C = x_nhwc.shape
    P = _ROWS_PER_BAND
    assert H % P == 0, "H must be a multiple of the band height"
    H2 = H // P
    PWC = P * W * C
    PWCh = w1big.shape[1]

    # 2-way parallel split (keeps both v7x TensorCores busy) with B/2 batch elements
    # folded into the matmul M per step; odd B folds into a single step.
    G = 2 if (B >= 2 and B % 2 == 0) else 1
    NB = B // G

    x2d = x_nhwc.reshape(B, H2, PWC)

    out2d = pl.pallas_call(
        _res_kernel,
        out_shape=jax.ShapeDtypeStruct((B, H2, PWC), x_nhwc.dtype),
        grid_spec=pltpu.PrefetchScalarGridSpec(
            num_scalar_prefetch=0,
            grid=(G,),
            in_specs=[
                pl.BlockSpec((NB, H2, PWC), lambda g: (g, 0, 0)),
                pl.BlockSpec((PWC, PWCh), lambda g: (0, 0)),
                pl.BlockSpec((1, PWCh), lambda g: (0, 0)),
                pl.BlockSpec((1, PWCh), lambda g: (0, 0)),
                pl.BlockSpec((3 * PWCh, PWC), lambda g: (0, 0)),
                pl.BlockSpec((1, PWC), lambda g: (0, 0)),
                pl.BlockSpec((1, PWC), lambda g: (0, 0)),
            ],
            out_specs=pl.BlockSpec((NB, H2, PWC), lambda g: (g, 0, 0)),
        ),
        compiler_params=pltpu.CompilerParams(
            dimension_semantics=("parallel",),
            vmem_limit_bytes=32 * 1024 * 1024,
        ),
    )(x2d, w1big, s1r, b1r, w2toe, s2r, b2r)

    return out2d.reshape(B, H, W, C)


def _fold_bn(gamma, beta, mean, var, eps=1e-3):
    scale = gamma / jnp.sqrt(var + eps)
    bias = beta - mean * scale
    return scale, bias


def _ref_forward_nchw(x, w1_oihw, s1, b1, w2_oihw, s2, b2):
    dn = ("NCHW", "OIHW", "NCHW")
    y1 = lax.conv_general_dilated(x, w1_oihw, (1, 1), [(0, 0), (0, 0)],
                                  dimension_numbers=dn)
    y1 = jnp.maximum(y1 * s1[None, :, None, None] + b1[None, :, None, None], 0.0)
    y2 = lax.conv_general_dilated(y1, w2_oihw, (1, 1), [(1, 1), (1, 1)],
                                  dimension_numbers=dn)
    y2 = jnp.maximum(y2 * s2[None, :, None, None] + b2[None, :, None, None], 0.0)
    return x + y2


if __name__ == "__main__":
    key = jax.random.PRNGKey(0)
    B, C, H, W = 2, 4, 16, 16
    Ch = C  # hidden defaults to in_channels

    ks = jax.random.split(key, 8)
    # Input in PyTorch NCHW convention.
    x_nchw = jax.random.normal(ks[0], (B, C, H, W), dtype=jnp.float32)

    # Conv weights (PyTorch OIHW layout), deterministic init.
    w1_oihw = jax.random.normal(ks[1], (Ch, C, 1, 1), dtype=jnp.float32) * 0.2
    w2_oihw = jax.random.normal(ks[2], (C, Ch, 3, 3), dtype=jnp.float32) * 0.1

    # BatchNorm parameters / running stats (eval mode), deterministic init.
    g1 = 1.0 + 0.1 * jax.random.normal(ks[3], (Ch,), dtype=jnp.float32)
    beta1 = 0.1 * jax.random.normal(ks[4], (Ch,), dtype=jnp.float32)
    m1 = jnp.zeros((Ch,), jnp.float32)
    v1 = jnp.ones((Ch,), jnp.float32)
    g2 = 1.0 + 0.1 * jax.random.normal(ks[5], (C,), dtype=jnp.float32)
    beta2 = 0.1 * jax.random.normal(ks[6], (C,), dtype=jnp.float32)
    m2 = jnp.zeros((C,), jnp.float32)
    v2 = jnp.ones((C,), jnp.float32)

    s1, b1 = _fold_bn(g1, beta1, m1, v1)
    s2, b2 = _fold_bn(g2, beta2, m2, v2)

    # Repack conv weights for the NHWC / band-packed kernel.
    w1_k = jnp.transpose(w1_oihw[:, :, 0, 0], (1, 0))   # (C, Ch): in -> hidden
    w2_k = jnp.transpose(w2_oihw, (2, 3, 1, 0))         # (kh, kw, Ch, C)

    # Weight packing hoisted out of the per-call forward (weights are static).
    packed = pack_res_params(w1_k, s1, b1, w2_k, s2, b2, W)

    x_nhwc = jnp.transpose(x_nchw, (0, 2, 3, 1))
    fwd = jax.jit(res_forward_pallas)
    out_nhwc = fwd(x_nhwc, packed)
    out_nchw = jnp.transpose(out_nhwc, (0, 3, 1, 2))
    jax.block_until_ready(out_nchw)

    ref = _ref_forward_nchw(x_nchw, w1_oihw, s1, b1, w2_oihw, s2, b2)
    # bf16 MXU inputs (per perf guidance) => relaxed tolerance vs the f32 reference.
    assert jnp.allclose(out_nchw, ref, atol=5e-2, rtol=5e-2), "mismatch vs reference"

    print("KERNEL_OK")
</pallas_src>

<mosaic_0001>
module attributes {stable_mosaic.version = 11 : i64} {
  func.func @_res_kernel(%arg0: i32, %arg1: memref<1x8x128xf32, #tpu.memory_space<vmem>>, %arg2: memref<128x128xbf16, #tpu.memory_space<vmem>>, %arg3: memref<1x128xf32, #tpu.memory_space<vmem>>, %arg4: memref<1x128xf32, #tpu.memory_space<vmem>>, %arg5: memref<384x128xbf16, #tpu.memory_space<vmem>>, %arg6: memref<1x128xf32, #tpu.memory_space<vmem>>, %arg7: memref<1x128xf32, #tpu.memory_space<vmem>>, %arg8: memref<1x8x128xf32, #tpu.memory_space<vmem>>) attributes {dimension_semantics = [#tpu.dimension_semantics<parallel>], iteration_bounds = array<i64: 2>, scalar_prefetch = 0 : i64, scratch_operands = 0 : i64, tpu.core_type = #tpu.core_type<tc>, window_params = [{transform_indices = @transform_0, window_bounds = array<i64: 1, 8, 128>}, {pipeline_mode = #tpu.pipeline_mode<synchronous>, transform_indices = @transform_1, window_bounds = array<i64: 128, 128>}, {pipeline_mode = #tpu.pipeline_mode<synchronous>, transform_indices = @transform_2, window_bounds = array<i64: 1, 128>}, {pipeline_mode = #tpu.pipeline_mode<synchronous>, transform_indices = @transform_3, window_bounds = array<i64: 1, 128>}, {pipeline_mode = #tpu.pipeline_mode<synchronous>, transform_indices = @transform_4, window_bounds = array<i64: 384, 128>}, {pipeline_mode = #tpu.pipeline_mode<synchronous>, transform_indices = @transform_5, window_bounds = array<i64: 1, 128>}, {pipeline_mode = #tpu.pipeline_mode<synchronous>, transform_indices = @transform_6, window_bounds = array<i64: 1, 128>}, {transform_indices = @transform_7, window_bounds = array<i64: 1, 8, 128>}]} {
    %c0 = arith.constant 0 : index
    %c0_0 = arith.constant 0 : index
    %c0_1 = arith.constant 0 : index
    %0 = vector.load %arg1[%c0, %c0_0, %c0_1] : memref<1x8x128xf32, #tpu.memory_space<vmem>>, vector<1x8x128xf32>
    %1 = vector.shape_cast %0 : vector<1x8x128xf32> to vector<8x128xf32>
    %2 = arith.truncf %1 : vector<8x128xf32> to vector<8x128xbf16>
    %c0_2 = arith.constant 0 : index
    %c0_3 = arith.constant 0 : index
    %3 = vector.load %arg2[%c0_2, %c0_3] : memref<128x128xbf16, #tpu.memory_space<vmem>>, vector<128x128xbf16>
    %cst = arith.constant dense<0.000000e+00> : vector<8x128xf32>
    %4 = tpu.matmul %2, %3, %cst {dimension_numbers = #tpu.dot_dimension_numbers<[1], [0], [0], [1], [0, 0, 1, 1], [], []>} : vector<8x128xbf16>, vector<128x128xbf16>, vector<8x128xf32> -> vector<8x128xf32>
    %c0_4 = arith.constant 0 : index
    %c0_5 = arith.constant 0 : index
    %5 = vector.load %arg3[%c0_4, %c0_5] : memref<1x128xf32, #tpu.memory_space<vmem>>, vector<1x128xf32>
    %6 = vector.broadcast %5 : vector<1x128xf32> to vector<8x128xf32>
    %7 = arith.mulf %4, %6 : vector<8x128xf32>
    %c0_6 = arith.constant 0 : index
    %c0_7 = arith.constant 0 : index
    %8 = vector.load %arg4[%c0_6, %c0_7] : memref<1x128xf32, #tpu.memory_space<vmem>>, vector<1x128xf32>
    %9 = vector.broadcast %8 : vector<1x128xf32> to vector<8x128xf32>
    %10 = arith.addf %7, %9 : vector<8x128xf32>
    %cst_8 = arith.constant 0.000000e+00 : f32
    %11 = vector.broadcast %cst_8 : f32 to vector<8x128xf32>
    %12 = arith.maximumf %10, %11 : vector<8x128xf32>
    %cst_9 = arith.constant 0.000000e+00 : f32
    %13 = vector.broadcast %cst_9 : f32 to vector<1x128xf32>
    %14 = vector.extract_strided_slice %12 {offsets = [0, 0], sizes = [7, 128], strides = [1, 1]} : vector<8x128xf32> to vector<7x128xf32>
    %15 = tpu.concatenate %13, %14 in 0 : vector<1x128xf32>, vector<7x128xf32> -> vector<8x128xf32>
    %16 = vector.extract_strided_slice %12 {offsets = [1, 0], sizes = [7, 128], strides = [1, 1]} : vector<8x128xf32> to vector<7x128xf32>
    %17 = tpu.concatenate %16, %13 in 0 : vector<7x128xf32>, vector<1x128xf32> -> vector<8x128xf32>
    %18 = tpu.concatenate %15, %12, %17 in 1 : vector<8x128xf32>, vector<8x128xf32>, vector<8x128xf32> -> vector<8x384xf32>
    %19 = arith.truncf %18 : vector<8x384xf32> to vector<8x384xbf16>
    %c0_10 = arith.constant 0 : index
    %c0_11 = arith.constant 0 : index
    %20 = vector.load %arg5[%c0_10, %c0_11] : memref<384x128xbf16, #tpu.memory_space<vmem>>, vector<384x128xbf16>
    %cst_12 = arith.constant dense<0.000000e+00> : vector<8x128xf32>
    %21 = tpu.matmul %19, %20, %cst_12 {dimension_numbers = #tpu.dot_dimension_numbers<[1], [0], [0], [1], [0, 0, 1, 1], [], []>} : vector<8x384xbf16>, vector<384x128xbf16>, vector<8x128xf32> -> vector<8x128xf32>
    %c0_13 = arith.constant 0 : index
    %c0_14 = arith.constant 0 : index
    %22 = vector.load %arg6[%c0_13, %c0_14] : memref<1x128xf32, #tpu.memory_space<vmem>>, vector<1x128xf32>
    %23 = vector.broadcast %22 : vector<1x128xf32> to vector<8x128xf32>
    %24 = arith.mulf %21, %23 : vector<8x128xf32>
    %c0_15 = arith.constant 0 : index
    %c0_16 = arith.constant 0 : index
    %25 = vector.load %arg7[%c0_15, %c0_16] : memref<1x128xf32, #tpu.memory_space<vmem>>, vector<1x128xf32>
    %26 = vector.broadcast %25 : vector<1x128xf32> to vector<8x128xf32>
    %27 = arith.addf %24, %26 : vector<8x128xf32>
    %cst_17 = arith.constant 0.000000e+00 : f32
    %28 = vector.broadcast %cst_17 : f32 to vector<8x128xf32>
    %29 = arith.maximumf %27, %28 : vector<8x128xf32>
    %30 = arith.addf %1, %29 : vector<8x128xf32>
    %31 = vector.shape_cast %30 : vector<8x128xf32> to vector<1x8x128xf32>
    %c0_18 = arith.constant 0 : index
    %c0_19 = arith.constant 0 : index
    %c0_20 = arith.constant 0 : index
    %32 = vector.load %arg8[%c0_18, %c0_19, %c0_20] : memref<1x8x128xf32, #tpu.memory_space<vmem>>, vector<1x8x128xf32>
    tpu.vector_store %arg8[%c0_18, %c0_19, %c0_20], %31 {strides = array<i32>} : memref<1x8x128xf32, #tpu.memory_space<vmem>>, vector<1x8x128xf32>,
    return
  }
  func.func @transform_0(%arg0: i32) -> (i32, i32, i32) {
    %c0_i32 = arith.constant 0 : i32
    %c0_i32_0 = arith.constant 0 : i32
    %c0_i32_1 = arith.constant 0 : i32
    return %arg0, %c0_i32, %c0_i32_0 : i32, i32, i32
  }
  func.func @transform_1(%arg0: i32) -> (i32, i32) {
    %c0_i32 = arith.constant 0 : i32
    %c0_i32_0 = arith.constant 0 : i32
    %c0_i32_1 = arith.constant 0 : i32
    return %c0_i32, %c0_i32_0 : i32, i32
  }
  func.func @transform_2(%arg0: i32) -> (i32, i32) {
    %c0_i32 = arith.constant 0 : i32
    %c0_i32_0 = arith.constant 0 : i32
    %c0_i32_1 = arith.constant 0 : i32
    return %c0_i32, %c0_i32_0 : i32, i32
  }
  func.func @transform_3(%arg0: i32) -> (i32, i32) {
    %c0_i32 = arith.constant 0 : i32
    %c0_i32_0 = arith.constant 0 : i32
    %c0_i32_1 = arith.constant 0 : i32
    return %c0_i32, %c0_i32_0 : i32, i32
  }
  func.func @transform_4(%arg0: i32) -> (i32, i32) {
    %c0_i32 = arith.constant 0 : i32
    %c0_i32_0 = arith.constant 0 : i32
    %c0_i32_1 = arith.constant 0 : i32
    return %c0_i32, %c0_i32_0 : i32, i32
  }
  func.func @transform_5(%arg0: i32) -> (i32, i32) {
    %c0_i32 = arith.constant 0 : i32
    %c0_i32_0 = arith.constant 0 : i32
    %c0_i32_1 = arith.constant 0 : i32
    return %c0_i32, %c0_i32_0 : i32, i32
  }
  func.func @transform_6(%arg0: i32) -> (i32, i32) {
    %c0_i32 = arith.constant 0 : i32
    %c0_i32_0 = arith.constant 0 : i32
    %c0_i32_1 = arith.constant 0 : i32
    return %c0_i32, %c0_i32_0 : i32, i32
  }
  func.func @transform_7(%arg0: i32) -> (i32, i32, i32) {
    %c0_i32 = arith.constant 0 : i32
    %c0_i32_0 = arith.constant 0 : i32
    %c0_i32_1 = arith.constant 0 : i32
    return %arg0, %c0_i32, %c0_i32_0 : i32, i32, i32
  }
}

</mosaic_0001>

<bundles_post_ra>
// kernel: res_forward_pallas.1
= control target key start
LH: loop header
LB: loop body
LE: loop exit
PB: predicated region body
PF: predicated region fallthrough
CT: control target
= control target key end

     0   :  { %s910_s24 = smov 0   ;;  %s1046_s0 = inlined_call_operand.vmem [shape: f32[2,8,128], index: 0, kind: input, shape index: {}]   ;;  %s1047_s1 = inlined_call_operand.vmem [shape: bf16[128,128], index: 1, kind: input, shape index: {}]   ;;  %s1048_s2 = inlined_call_operand.vmem [shape: f32[1,128], index: 2, kind: input, shape index: {}]   ;;  %s1049_s3 = inlined_call_operand.vmem [shape: f32[1,128], index: 3, kind: input, shape index: {}]   ;;  %s1050_s4 = inlined_call_operand.vmem [shape: bf16[384,128], index: 4, kind: input, shape index: {}]   ;;  %s1051_s5 = inlined_call_operand.vmem [shape: f32[1,128], index: 5, kind: input, shape index: {}]   ;;  %s1052_s6 = inlined_call_operand.vmem [shape: f32[1,128], index: 6, kind: input, shape index: {}]   ;;  %s1053_s7 = inlined_call_operand.vmem [shape: f32[2,8,128], index: 7, kind: output, shape index: {}]  }
   0x1 LB: > { %s673_s25 = sadd.s32 4294967295, %s868_s24   ;;  %p677_p0 = scmp.ge.s32.totalorder %s868_s24, 1  ;;  %s868_s24 = sphi %s910_s24, %s17_s24  }
   0x2   : > { %p236_p1 = scmp.lt.s32.totalorder %s868_s24, 3 }
   0x4   : > { %p237_p2 = pnand %p677_p0, %p236_p1 }
   0x5   : > { %p266_p3 = scmp.lt.s32.totalorder (!%p237_p2), %s673_s25, 1 }
   0x6   : > { %240 = sbr.rel (%p237_p2) target bundleno = 322 (0x142), region = 48 }
   0xb   : > { %v825_v0 = vld [vmem:[%s1047_s1 + $0x38] sm:$0xff]  ;;  %v824_v1 = vld [vmem:[%s1047_s1 + $0x30] sm:$0xff]  ;;  %v823_v8 = vld [vmem:[%s1047_s1 + $0x28] sm:$0xff]  ;;  %s1055_s25 = smov (!%p266_p3, %s673_s25), 1  ;;  %vm367_vm0 = vcmask 1040384   ;;  %vm371_vm2 = vcmask 1046528  }
   0xc   : > { %340 = vmatpush.bf16.msra.mxu0 %v825_v0  ;;  %v841_v2 = vld [vmem:[%s1050_s4 + $0x78] sm:$0xff]  ;;  %v840_v5 = vld [vmem:[%s1050_s4 + $0x70] sm:$0xff]  ;;  %v839_v9 = vld [vmem:[%s1050_s4 + $0x68] sm:$0xff]  ;;  %s678_s26 = sshll.u32 %s1055_s25, 3 }
   0xd   : > { %v833_v3 = vld [vmem:[%s1050_s4 + $0x38] sm:$0xff]  ;;  %581 = vmatpush.bf16.msra.mxu2 %v841_v2  ;;  %v832_v6 = vld [vmem:[%s1050_s4 + $0x30] sm:$0xff]  ;;  %v831_v10 = vld [vmem:[%s1050_s4 + $0x28] sm:$0xff]  ;;  %s269_s10 = scalar_lea.vmem %s1046_s0, %s678_s26  ;;  %s273_s19 = scalar_lea.vmem %s1053_s7, %s678_s26 }
   0xe   : > { %v849_v4 = vld [vmem:[%s1050_s4 + $0xb8] sm:$0xff]  ;;  %568 = vmatpush.bf16.msra.mxu1 %v833_v3  ;;  %v848_v7 = vld [vmem:[%s1050_s4 + $0xb0] sm:$0xff]  ;;  %v847_v11 = vld [vmem:[%s1050_s4 + $0xa8] sm:$0xff] }
   0xf   : > { %594 = vmatpush.bf16.msra.mxu3 %v849_v4  ;;  %v822_v12 = vld [vmem:[%s1047_s1 + $0x20] sm:$0xff]  ;;  %v821_v16 = vld [vmem:[%s1047_s1 + $0x18] sm:$0xff]  ;;  %v820_v20 = vld [vmem:[%s1047_s1 + $0x10] sm:$0xff] }
  0x10   : > { %341 = vmatpush.bf16.msra.mxu0 %v824_v1  ;;  %v838_v13 = vld [vmem:[%s1050_s4 + $0x60] sm:$0xff]  ;;  %v837_v17 = vld [vmem:[%s1050_s4 + $0x58] sm:$0xff]  ;;  %v836_v21 = vld [vmem:[%s1050_s4 + $0x50] sm:$0xff] }
  0x11   : > { %582 = vmatpush.bf16.msra.mxu2 %v840_v5  ;;  %v830_v14 = vld [vmem:[%s1050_s4 + $0x20] sm:$0xff]  ;;  %v829_v18 = vld [vmem:[%s1050_s4 + $0x18] sm:$0xff]  ;;  %v819_v22 = vld [vmem:[%s1047_s1 + $0x8] sm:$0xff] }
  0x12   : > { %569 = vmatpush.bf16.msra.mxu1 %v832_v6  ;;  %v846_v15 = vld [vmem:[%s1050_s4 + $0xa0] sm:$0xff]  ;;  %v845_v19 = vld [vmem:[%s1050_s4 + $0x98] sm:$0xff]  ;;  %v828_v26 = vld [vmem:[%s1050_s4 + $0x10] sm:$0xff] }
  0x13   : > { %595 = vmatpush.bf16.msra.mxu3 %v848_v7  ;;  %v818_v23 = vld [vmem:[%s1047_s1] sm:$0xff]  ;;  %v844_v27 = vld [vmem:[%s1050_s4 + $0x90] sm:$0xff]  ;;  %v835_v28 = vld [vmem:[%s1050_s4 + $0x48] sm:$0xff] }
  0x14   : > { %342 = vmatpush.bf16.msra.mxu0 %v823_v8  ;;  %v274_v24 = vld [vmem:[%s269_s10] sm:$0xff]  ;;  %v827_v29 = vld [vmem:[%s1050_s4 + $0x8] sm:$0xff]  ;;  %vm808_vm1 = vmneg %vm367_vm0 }
  0x15   : > { %583 = vmatpush.bf16.msra.mxu2 %v839_v9  ;;  %v275_v25 = vpack.c.bf16 %v274_v24, %v274_v24  ;;  %v843_v30 = vld [vmem:[%s1050_s4 + $0x88] sm:$0xff]  ;;  %v834_v31 = vld [vmem:[%s1050_s4 + $0x40] sm:$0xff]  ;;  %vm810_vm3 = vmpackc.low %vm808_vm1, %vm808_vm1 }
  0x16   : > { %570 = vmatpush.bf16.msra.mxu1 %v831_v10  ;;  %v826_v32 = vld [vmem:[%s1050_s4] sm:$0xff]  ;;  %vm813_vm4 = vmpackc.low %vm371_vm2, %vm371_vm2 }
  0x17   : > { %596 = vmatpush.bf16.msra.mxu3 %v847_v11  ;;  %v842_v33 = vld [vmem:[%s1050_s4 + $0x80] sm:$0xff] }
  0x18   : > { %343 = vmatpush.bf16.msra.mxu0 %v822_v12  ;;  %v858_v34 = vld [vmem:[%s1048_s2] ss:$0 sm:$0xff] }
  0x19   : > { %584 = vmatpush.bf16.msra.mxu2 %v838_v13  ;;  %v859_v35 = vld [vmem:[%s1049_s3] ss:$0 sm:$0xff] }
  0x1a   : > { %571 = vmatpush.bf16.msra.mxu1 %v830_v14  ;;  %v860_v49 = vld [vmem:[%s1051_s5] ss:$0 sm:$0xff] }
  0x1b   : > { %597 = vmatpush.bf16.msra.mxu3 %v846_v15  ;;  %v861_v52 = vld [vmem:[%s1052_s6] ss:$0 sm:$0xff] }
  0x1c   : > { %344 = vmatpush.bf16.msra.mxu0 %v821_v16 }
  0x1d   : > { %585 = vmatpush.bf16.msra.mxu2 %v837_v17 }
  0x1e   : > { %572 = vmatpush.bf16.msra.mxu1 %v829_v18 }
  0x1f   : > { %598 = vmatpush.bf16.msra.mxu3 %v845_v19 }
  0x20   : > { %345 = vmatpush.bf16.msra.mxu0 %v820_v20 }
  0x21   : > { %586 = vmatpush.bf16.msra.mxu2 %v836_v21 }
  0x22   : > { %573 = vmatpush.bf16.msra.mxu1 %v828_v26 }
  0x23   : > { %599 = vmatpush.bf16.msra.mxu3 %v844_v27 }
  0x24   : > { %346 = vmatpush.bf16.msra.mxu0 %v819_v22 }
  0x25   : > { %587 = vmatpush.bf16.msra.mxu2 %v835_v28 }
  0x26   : > { %574 = vmatpush.bf16.msra.mxu1 %v827_v29 }
  0x27   : > { %600 = vmatpush.bf16.msra.mxu3 %v843_v30 }
  0x28   : > { %347 = vmatpush.bf16.msra.mxu0 %v818_v23 }
  0x29   : > { %588 = vmatpush.bf16.msra.mxu2 %v834_v31 }
  0x2a   : > { %575 = vmatpush.bf16.msra.mxu1 %v826_v32 }
  0x2b   : > { %348 = vmatmul.bf16.vlgmr.msra.gmra.mxu0 %v275_v25  ;;  %601 = vmatpush.bf16.msra.mxu3 %v842_v33 }
  0xa8   : > { %v349_v36 = vpop.f32.mrf.mxu0 }
  0xa9   : > { %v357_v37 = vmul.f32 %v858_v34, %v349_v36 }
  0xab   : > { %v362_v38 = vadd.f32 %v859_v35, %v357_v37 }
  0xad   : > { %v363_v39 = vmax.f32 %v362_v38, 0.0 }
  0xaf   : > { %v374_v40 = vpack.c.bf16 %v363_v39, %v363_v39  ;;  %v365_v41 = vrot.slane %v363_v39, 7  ;;  %v369_v42 = vrot.slane %v363_v39, 1 }
  0xb0   : > { %v351_v43 = vpop.f32.mrf.mxu0 }
  0xb1   : > { %589 = vmatmul.bf16.vlgmr.msra.gmra.mxu2 %v374_v40  ;;  %v811_v44 = vpack.c.bf16 %v365_v41, %v365_v41  ;;  %v814_v45 = vpack.c.bf16 %v369_v42, %v369_v42 }
  0xb3   : > { %812 = vmatmul.msk.bf16.vlgmr.msra.gmra.mxu1 %vm810_vm3, %v811_v44  ;;  %815 = vmatmul.msk.bf16.vlgmr.msra.gmra.mxu3 %vm813_vm4, %v814_v45 }
 0x130   : > { %v577_v46 = vpop.f32.mrf.mxu1 }
 0x134   : > { %v590_v47 = vpop.f32.mrf.mxu2 }
 0x135   : > { %v591_v48 = vadd.f32 %v590_v47, %v577_v46 }
 0x136   : > { %v603_v50 = vpop.f32.mrf.mxu3 }
 0x137   : > { %v604_v51 = vadd.f32 %v603_v50, %v591_v48 }
 0x138   : > { %v579_v53 = vpop.f32.mrf.mxu1 }
 0x139   : > { %v611_v54 = vmul.f32 %v860_v49, %v604_v51 }
 0x13b   : > { %v616_v55 = vadd.f32 %v861_v52, %v611_v54 }
 0x13c   : > { %v592_v56 = vpop.f32.mrf.mxu2 }
 0x13d   : > { %v617_v57 = vmax.f32 %v616_v55, 0.0 }
 0x13e   : > { %v605_v58 = vpop.f32.mrf.mxu3 }
 0x13f   : > { %v618_v59 = vadd.f32 %v617_v57, %v274_v24 }
 0x141   : > { %619 = vst [vmem:[%s273_s19] sm:$0xff] %v618_v59 }
 0x142 PF: > { %s17_s24 = sadd.s32 1, %s868_s24  }
 0x143   : > { %p14_p4 = scmp.ge.s32.totalorder %s17_s24, 4  }
 0x145   :  { %16 = sbr.rel (!%p14_p4) target bundleno = 1 (0x1), region = 78 }

</bundles_post_ra>
